<compile_context>
chip_gen: v5e
topology: v5e:2x2
jax: 0.10.0
libtpu: 0.0.40
codegen_flags: <defaults>
</compile_context>

<pallas_src>
import jax
import jax.numpy as jnp
from jax.experimental import pallas as pl
from jax.experimental.pallas import tpu as pltpu


def _normalize_affine_kernel(scale_ref, bias_ref, x_ref, o_ref):
    # scale_ref / bias_ref: (tr, 1) f32 per-row constants (broadcast over lanes)
    # x_ref / o_ref:        (tr, tc) tiles of the flattened image
    o_ref[...] = (x_ref[...] * scale_ref[...] + bias_ref[...]).astype(o_ref.dtype)


def _choose_tile(total, align, cap):
    """Largest t that divides `total`, is a multiple of `align`, and t <= max(cap, align).
    Falls back to the full extent `total` (always a legal block dim)."""
    cap = max(cap, align)
    if total <= cap:
        return total
    if total % align != 0:
        return total
    t = (cap // align) * align
    while t >= align:
        if total % t == 0:
            return t
        t -= align
    return total


# ~2 MiB per x/o block: big enough to amortize the ~0.35 us/step grid overhead
# and sit near the HBM roofline, small enough that double-buffered in+out fits
# the default scoped VMEM on v5e/v6e/v7x alike.
_TARGET_BLOCK_BYTES = 2 * 1024 * 1024


def normalization_forward(img, mean, std):
    """img: (N, C, H, W); mean/std: (C,) per-channel constants."""
    N, C, H, W = img.shape
    R = N * C
    L = H * W
    itemsize = jnp.dtype(img.dtype).itemsize

    # Fold (x - mean) / std  ->  x * scale + bias.  Keep constants in f32 so a
    # bf16 img does not lose precision in the constants.
    scale_c = (1.0 / std).astype(jnp.float32)
    bias_c = (-mean / std).astype(jnp.float32)
    scale = jnp.tile(scale_c, N).reshape(R, 1)   # per flattened (n, c) row
    bias = jnp.tile(bias_c, N).reshape(R, 1)

    # Lane-dense flat view; NCHW is contiguous so this reshape is free.
    x2 = img.reshape(R, L)

    target_elems = max(1, _TARGET_BLOCK_BYTES // itemsize)
    tc = _choose_tile(L, 128, target_elems)           # lane axis: multiple of 128 (or full)
    tr = _choose_tile(R, 8, max(1, target_elems // tc))  # sublane axis: multiple of 8 (or full)
    grid = (R // tr, L // tc)

    nbytes = img.size * itemsize
    cost = pl.CostEstimate(
        flops=2 * img.size,
        transcendentals=0,
        bytes_accessed=2 * nbytes + 2 * R * 4,
    )

    out2 = pl.pallas_call(
        _normalize_affine_kernel,
        out_shape=jax.ShapeDtypeStruct((R, L), img.dtype),
        grid_spec=pltpu.PrefetchScalarGridSpec(
            num_scalar_prefetch=0,
            grid=grid,
            in_specs=[
                # Block index ignores the (inner) column axis -> fetched only
                # when the row block changes, not every grid step.
                pl.BlockSpec((tr, 1), lambda i, j: (i, 0)),   # scale
                pl.BlockSpec((tr, 1), lambda i, j: (i, 0)),   # bias
                pl.BlockSpec((tr, tc), lambda i, j: (i, j)),  # x
            ],
            out_specs=pl.BlockSpec((tr, tc), lambda i, j: (i, j)),
        ),
        compiler_params=pltpu.CompilerParams(
            dimension_semantics=("parallel", "parallel"),
            vmem_limit_bytes=48 * 1024 * 1024,
        ),
        cost_estimate=cost,
    )(scale, bias, x2)

    return out2.reshape(N, C, H, W)


if __name__ == "__main__":
    key = jax.random.PRNGKey(0)
    N, C, H, W = 2, 3, 16, 16

    img = jax.random.uniform(key, (N, C, H, W), dtype=jnp.float32)

    # Deterministic per-channel normalization constants (ImageNet-style).
    mean = jnp.array([0.485, 0.456, 0.406], dtype=jnp.float32)
    std = jnp.array([0.229, 0.224, 0.225], dtype=jnp.float32)

    out = normalization_forward(img, mean, std)
    out = jax.block_until_ready(out)

    # Reference check (plain JAX, mirrors PyTorch broadcasting semantics).
    ref = (img - mean.reshape(-1, 1, 1)) / std.reshape(-1, 1, 1)
    assert out.shape == (N, C, H, W)
    assert jnp.allclose(out, ref, atol=1e-5, rtol=1e-5)

    print("KERNEL_OK")
</pallas_src>

<mosaic_0001>
module attributes {stable_mosaic.version = 11 : i64} {
  func.func @_normalize_affine_kernel(%arg0: i32, %arg1: i32, %arg2: memref<6x1xf32, #tpu.memory_space<vmem>>, %arg3: memref<6x1xf32, #tpu.memory_space<vmem>>, %arg4: memref<6x256xf32, #tpu.memory_space<vmem>>, %arg5: memref<6x256xf32, #tpu.memory_space<vmem>>) attributes {dimension_semantics = [#tpu.dimension_semantics<parallel>, #tpu.dimension_semantics<parallel>], iteration_bounds = array<i64: 1, 1>, scalar_prefetch = 0 : i64, scratch_operands = 0 : i64, tpu.core_type = #tpu.core_type<tc>, window_params = [{transform_indices = @transform_0, window_bounds = array<i64: 6, 1>}, {transform_indices = @transform_1, window_bounds = array<i64: 6, 1>}, {transform_indices = @transform_2, window_bounds = array<i64: 6, 256>}, {transform_indices = @transform_3, window_bounds = array<i64: 6, 256>}]} {
    %c0 = arith.constant 0 : index
    %c0_0 = arith.constant 0 : index
    %0 = vector.load %arg4[%c0, %c0_0] : memref<6x256xf32, #tpu.memory_space<vmem>>, vector<6x256xf32>
    %c0_1 = arith.constant 0 : index
    %c0_2 = arith.constant 0 : index
    %1 = vector.load %arg2[%c0_1, %c0_2] : memref<6x1xf32, #tpu.memory_space<vmem>>, vector<6x1xf32>
    %2 = vector.broadcast %1 : vector<6x1xf32> to vector<6x256xf32>
    %3 = arith.mulf %0, %2 : vector<6x256xf32>
    %c0_3 = arith.constant 0 : index
    %c0_4 = arith.constant 0 : index
    %4 = vector.load %arg3[%c0_3, %c0_4] : memref<6x1xf32, #tpu.memory_space<vmem>>, vector<6x1xf32>
    %5 = vector.broadcast %4 : vector<6x1xf32> to vector<6x256xf32>
    %6 = arith.addf %3, %5 : vector<6x256xf32>
    %c0_5 = arith.constant 0 : index
    %c0_6 = arith.constant 0 : index
    %7 = vector.load %arg5[%c0_5, %c0_6] : memref<6x256xf32, #tpu.memory_space<vmem>>, vector<6x256xf32>
    tpu.vector_store %arg5[%c0_5, %c0_6], %6 {strides = array<i32>} : memref<6x256xf32, #tpu.memory_space<vmem>>, vector<6x256xf32>,
    return
  }
  func.func @transform_0(%arg0: i32, %arg1: i32) -> (i32, i32) {
    %c0_i32 = arith.constant 0 : i32
    %c0_i32_0 = arith.constant 0 : i32
    return %arg0, %c0_i32 : i32, i32
  }
  func.func @transform_1(%arg0: i32, %arg1: i32) -> (i32, i32) {
    %c0_i32 = arith.constant 0 : i32
    %c0_i32_0 = arith.constant 0 : i32
    return %arg0, %c0_i32 : i32, i32
  }
  func.func @transform_2(%arg0: i32, %arg1: i32) -> (i32, i32) {
    %c0_i32 = arith.constant 0 : i32
    return %arg0, %arg1 : i32, i32
  }
  func.func @transform_3(%arg0: i32, %arg1: i32) -> (i32, i32) {
    %c0_i32 = arith.constant 0 : i32
    return %arg0, %arg1 : i32, i32
  }
}

</mosaic_0001>

<bundles_post_ra>
// kernel: tpu_custom_call.1
= control target key start
LH: loop header
LB: loop body
LE: loop exit
PB: predicated region body
PF: predicated region fallthrough
CT: control target
= control target key end

     0   :  { %v80_v1 = vmov 0   ;;  %s117_s0 = inlined_call_operand.vmem [shape: f32[6,1], index: 0, kind: input, shape index: {}]   ;;  %s118_s1 = inlined_call_operand.vmem [shape: f32[6,1], index: 1, kind: input, shape index: {}]   ;;  %s119_s2 = inlined_call_operand.vmem [shape: f32[6,256], index: 2, kind: input, shape index: {}]   ;;  %s120_s3 = inlined_call_operand.hbm [shape: f32[6,256], index: 3, kind: output, shape index: {}]  }
   0x1   :  { %v17_v0 = vld [vmem:[%s117_s0] sm:$0x3f]  ;;  %53 = vset.pattern.permute.xlu0 %v80_v1 }
   0x2   :  { %8 = vsyncpa [#allocation3], 0  ;;  %20 = vperm.xlu0 %53, %v17_v0   ;;  %v25_v2 = vld [vmem:[%s118_s1] sm:$0x3f]  ;;  %v16_v5 = vld [vmem:[%s119_s2 + $0x8] sm:$0x3f] }
   0x3   :  { %v15_v4 = vld [vmem:[%s119_s2] sm:$0x3f]  ;;  %s81_s0 = smov [#allocation2]   ;;  %s42_s23 = sshll.u32 %s120_s3, 4  ;;  %s43_s23 = int_to_ptr.hbm [resolvable:$true] %s42_s23 }
   0x4   :  { %s40_s20 = sshll.u32 %s81_s0, 4  ;;  %s41_s20 = int_to_ptr.vmem [resolvable:$true] %s40_s20 }
   0xa   :  { %28 = vperm.xlu0 %53, %v25_v2  }
  0x74   :  { %v21_v3 = vpop.permute.xlu0 %20 }
  0x75   :  { %v23_v6 = vmul.f32 %v21_v3, %v15_v4  ;;  %v24_v7 = vmul.f32 %v21_v3, %v16_v5 }
  0x7c   :  { %v29_v8 = vpop.permute.xlu0 %28 }
  0x7d   :  { %v31_v9 = vadd.f32 %v29_v8, %v23_v6  ;;  %v32_v10 = vadd.f32 %v29_v8, %v24_v7 }
  0x7f   :  { %33 = vst [vmem:[#allocation2] sm:$0x3f] %v31_v9 }
  0x80   :  { %34 = vst [vmem:[#allocation2 + $0x8] sm:$0x3f] %v32_v10 }
  0x81   :  { %45 = dma.vmem_to_hbm [thread:$0]  %s41_s20, 256, %s43_s23, [#allocation3]  }
  0x82   :  { %78 = dma.done.wait [#allocation3], 256  }
  0x83   :  { %79 = vsyncadd [#allocation3], 4294967040 }
  0x84   :  { %50 = vsyncpa [#allocation3], 1 }

</bundles_post_ra>
